<compile_context>
chip_gen: v7x
topology: tpu7x:2x2x1
jax: 0.10.0
libtpu: 0.0.40
codegen_flags: <defaults>
</compile_context>

<pallas_src>
import jax
import jax.numpy as jnp
from jax.experimental import pallas as pl
from jax.experimental.pallas import tpu as pltpu

LN_EPS = 1e-5
TB_MAX = 2048        # max batch-tile rows


def _round_up(x, m):
    return (x + m - 1) // m * m


def _cdiv(a, b):
    return -(-a // b)


def skill_critic_kernel(obs_ref, w1_ref, b1_ref, g_ref, beta_ref,
                        w2_ref, b2_ref, w3_ref, b3_ref, out_ref):
    # --- trunk: Linear(obs_dim, feature_dim); cast obs tile to bf16 in-kernel ---
    obs = obs_ref[...].astype(jnp.bfloat16)
    h = jnp.dot(obs, w1_ref[...],
                preferred_element_type=jnp.float32) + b1_ref[...]

    # --- LayerNorm(feature_dim) in f32, fused single-pass statistics ---
    inv_d = 1.0 / h.shape[-1]
    mean = jnp.sum(h, axis=-1, keepdims=True) * inv_d
    mean_sq = jnp.sum(h * h, axis=-1, keepdims=True) * inv_d
    var = mean_sq - mean * mean
    h = (h - mean) * jax.lax.rsqrt(var + LN_EPS)
    h = h * g_ref[...] + beta_ref[...]

    # --- Tanh ---
    h = jnp.tanh(h)

    # --- q_net: Linear(feature_dim, hidden_dim) -> ReLU ---
    z = jnp.dot(h.astype(jnp.bfloat16), w2_ref[...],
                preferred_element_type=jnp.float32) + b2_ref[...]
    z = jnp.maximum(z, 0.0)

    # --- q_net: Linear(hidden_dim, skill_dim) ---
    q = jnp.dot(z.astype(jnp.bfloat16), w3_ref[...],
                preferred_element_type=jnp.float32) + b3_ref[...]
    out_ref[...] = q.astype(out_ref.dtype)


def prepare_params(params):
    """One-time prep: cast MXU weight streams to bf16. Biases / LN params stay f32."""
    return {
        "w1": params["w1"].astype(jnp.bfloat16),
        "b1": params["b1"],
        "ln_g": params["ln_g"],
        "ln_b": params["ln_b"],
        "w2": params["w2"].astype(jnp.bfloat16),
        "b2": params["b2"],
        "w3": params["w3"].astype(jnp.bfloat16),
        "b3": params["b3"],
    }


def skill_critic_forward(obs, p):
    """obs: (B, obs_dim) float32. p: output of prepare_params. Returns (B, skill_dim) f32."""
    B, obs_dim = obs.shape
    feature_dim = p["w1"].shape[1]
    hidden_dim = p["w2"].shape[1]
    skill_dim = p["w3"].shape[1]

    # ---- batch tiling: >=2 grid steps when possible (v7x megacore), <1 tile of padding ----
    b8 = _round_up(B, 8)
    n_steps = max(2, _cdiv(b8, TB_MAX))
    tb = _round_up(_cdiv(b8, n_steps), 8)
    b_pad = _round_up(b8, tb)
    if b_pad != B:
        obs = jnp.pad(obs, ((0, b_pad - B), (0, 0)))

    args = (obs, p["w1"], p["b1"], p["ln_g"], p["ln_b"],
            p["w2"], p["b2"], p["w3"], p["b3"])

    # Weights/biases: full-array blocks with constant index_map -> DMA'd once, resident.
    def resident_spec(a):
        return pl.BlockSpec(a.shape, lambda i: (0, 0))

    in_specs = [pl.BlockSpec((tb, obs_dim), lambda i: (i, 0))]
    in_specs += [resident_spec(a) for a in args[1:]]
    out_spec = pl.BlockSpec((tb, skill_dim), lambda i: (i, 0))

    flops = 2 * b_pad * (obs_dim * feature_dim
                         + feature_dim * hidden_dim
                         + hidden_dim * skill_dim)
    bytes_accessed = (sum(int(a.size) * a.dtype.itemsize for a in args)
                      + b_pad * skill_dim * 4)

    out = pl.pallas_call(
        skill_critic_kernel,
        out_shape=jax.ShapeDtypeStruct((b_pad, skill_dim), jnp.float32),
        grid=(b_pad // tb,),
        in_specs=in_specs,
        out_specs=out_spec,
        compiler_params=pltpu.CompilerParams(
            dimension_semantics=("parallel",),   # shards batch axis across TCs on v7x
            vmem_limit_bytes=32 * 1024 * 1024),
        cost_estimate=pl.CostEstimate(
            flops=flops,
            transcendentals=b_pad * (feature_dim + 1),
            bytes_accessed=bytes_accessed),
    )(*args)

    return out[:B] if b_pad != B else out


def init_params(key, obs_dim, skill_dim, feature_dim, hidden_dim):
    """Deterministic synthetic init (stand-in for utils.weight_init: random W, zero bias)."""
    k1, k2, k3 = jax.random.split(key, 3)
    scale = 0.1
    return {
        # Linear(obs_dim, feature_dim); torch weight is (out, in) -> store (in, out)
        "w1": scale * jax.random.normal(k1, (obs_dim, feature_dim), jnp.float32),
        "b1": jnp.zeros((1, feature_dim), jnp.float32),
        # LayerNorm(feature_dim): gamma=1, beta=0
        "ln_g": jnp.ones((1, feature_dim), jnp.float32),
        "ln_b": jnp.zeros((1, feature_dim), jnp.float32),
        # Linear(feature_dim, hidden_dim)
        "w2": scale * jax.random.normal(k2, (feature_dim, hidden_dim), jnp.float32),
        "b2": jnp.zeros((1, hidden_dim), jnp.float32),
        # Linear(hidden_dim, skill_dim)
        "w3": scale * jax.random.normal(k3, (hidden_dim, skill_dim), jnp.float32),
        "b3": jnp.zeros((1, skill_dim), jnp.float32),
    }


def reference_forward(obs, p):
    """Pure-JAX f32 reference for correctness check."""
    h = obs @ p["w1"] + p["b1"]
    mean = jnp.mean(h, axis=-1, keepdims=True)
    var = jnp.mean((h - mean) ** 2, axis=-1, keepdims=True)
    h = (h - mean) / jnp.sqrt(var + LN_EPS)
    h = jnp.tanh(h * p["ln_g"] + p["ln_b"])
    z = jnp.maximum(h @ p["w2"] + p["b2"], 0.0)
    return z @ p["w3"] + p["b3"]


if __name__ == "__main__":
    B, obs_dim, skill_dim, feature_dim, hidden_dim = 8, 32, 16, 64, 32

    key = jax.random.PRNGKey(0)
    k_obs, k_par = jax.random.split(key)
    obs = jax.random.normal(k_obs, (B, obs_dim), jnp.float32)
    params = init_params(k_par, obs_dim, skill_dim, feature_dim, hidden_dim)

    prepped = prepare_params(params)          # one-time weight prep, hoisted out of forward
    q = skill_critic_forward(obs, prepped)
    jax.block_until_ready(q)

    q_ref = reference_forward(obs, params)
    assert q.shape == (B, skill_dim)
    # bf16 MXU operands -> loosened tolerance vs the f32 reference
    assert jnp.allclose(q, q_ref, atol=2e-2, rtol=2e-2), "mismatch vs JAX reference"

    print("KERNEL_OK")
</pallas_src>

<mosaic_0001>
module attributes {stable_mosaic.version = 11 : i64} {
  func.func @skill_critic_kernel(%arg0: i32, %arg1: memref<8x32xf32, #tpu.memory_space<vmem>>, %arg2: memref<32x64xbf16, #tpu.memory_space<vmem>>, %arg3: memref<1x64xf32, #tpu.memory_space<vmem>>, %arg4: memref<1x64xf32, #tpu.memory_space<vmem>>, %arg5: memref<1x64xf32, #tpu.memory_space<vmem>>, %arg6: memref<64x32xbf16, #tpu.memory_space<vmem>>, %arg7: memref<1x32xf32, #tpu.memory_space<vmem>>, %arg8: memref<32x16xbf16, #tpu.memory_space<vmem>>, %arg9: memref<1x16xf32, #tpu.memory_space<vmem>>, %arg10: memref<8x16xf32, #tpu.memory_space<vmem>>) attributes {dimension_semantics = [#tpu.dimension_semantics<parallel>], iteration_bounds = array<i64: 1>, scalar_prefetch = 0 : i64, scratch_operands = 0 : i64, tpu.core_type = #tpu.core_type<tc>, window_params = [{transform_indices = @transform_0, window_bounds = array<i64: 8, 32>}, {pipeline_mode = #tpu.pipeline_mode<synchronous>, transform_indices = @transform_1, window_bounds = array<i64: 32, 64>}, {pipeline_mode = #tpu.pipeline_mode<synchronous>, transform_indices = @transform_2, window_bounds = array<i64: 1, 64>}, {pipeline_mode = #tpu.pipeline_mode<synchronous>, transform_indices = @transform_3, window_bounds = array<i64: 1, 64>}, {pipeline_mode = #tpu.pipeline_mode<synchronous>, transform_indices = @transform_4, window_bounds = array<i64: 1, 64>}, {pipeline_mode = #tpu.pipeline_mode<synchronous>, transform_indices = @transform_5, window_bounds = array<i64: 64, 32>}, {pipeline_mode = #tpu.pipeline_mode<synchronous>, transform_indices = @transform_6, window_bounds = array<i64: 1, 32>}, {pipeline_mode = #tpu.pipeline_mode<synchronous>, transform_indices = @transform_7, window_bounds = array<i64: 32, 16>}, {pipeline_mode = #tpu.pipeline_mode<synchronous>, transform_indices = @transform_8, window_bounds = array<i64: 1, 16>}, {transform_indices = @transform_9, window_bounds = array<i64: 8, 16>}]} {
    %c0 = arith.constant 0 : index
    %c0_0 = arith.constant 0 : index
    %0 = vector.load %arg1[%c0, %c0_0] : memref<8x32xf32, #tpu.memory_space<vmem>>, vector<8x32xf32>
    %1 = arith.truncf %0 : vector<8x32xf32> to vector<8x32xbf16>
    %c0_1 = arith.constant 0 : index
    %c0_2 = arith.constant 0 : index
    %2 = vector.load %arg2[%c0_1, %c0_2] : memref<32x64xbf16, #tpu.memory_space<vmem>>, vector<32x64xbf16>
    %cst = arith.constant dense<0.000000e+00> : vector<8x64xf32>
    %3 = tpu.matmul %1, %2, %cst {dimension_numbers = #tpu.dot_dimension_numbers<[1], [0], [0], [1], [0, 0, 1, 1], [], []>} : vector<8x32xbf16>, vector<32x64xbf16>, vector<8x64xf32> -> vector<8x64xf32>
    %c0_3 = arith.constant 0 : index
    %c0_4 = arith.constant 0 : index
    %4 = vector.load %arg3[%c0_3, %c0_4] : memref<1x64xf32, #tpu.memory_space<vmem>>, vector<1x64xf32>
    %5 = vector.broadcast %4 : vector<1x64xf32> to vector<8x64xf32>
    %6 = arith.addf %3, %5 : vector<8x64xf32>
    %cst_5 = arith.constant dense<0.000000e+00> : vector<8xf32>
    %7 = vector.multi_reduction <add>, %6, %cst_5 [1] : vector<8x64xf32> to vector<8xf32>
    %8 = vector.shape_cast %7 : vector<8xf32> to vector<8x1xf32>
    %cst_6 = arith.constant 1.562500e-02 : f32
    %9 = vector.broadcast %cst_6 : f32 to vector<8x1xf32>
    %10 = arith.mulf %8, %9 : vector<8x1xf32>
    %11 = arith.mulf %6, %6 : vector<8x64xf32>
    %cst_7 = arith.constant dense<0.000000e+00> : vector<8xf32>
    %12 = vector.multi_reduction <add>, %11, %cst_7 [1] : vector<8x64xf32> to vector<8xf32>
    %13 = vector.shape_cast %12 : vector<8xf32> to vector<8x1xf32>
    %cst_8 = arith.constant 1.562500e-02 : f32
    %14 = vector.broadcast %cst_8 : f32 to vector<8x1xf32>
    %15 = arith.mulf %13, %14 : vector<8x1xf32>
    %16 = arith.mulf %10, %10 : vector<8x1xf32>
    %17 = arith.subf %15, %16 : vector<8x1xf32>
    %18 = vector.broadcast %10 : vector<8x1xf32> to vector<8x64xf32>
    %19 = arith.subf %6, %18 : vector<8x64xf32>
    %cst_9 = arith.constant 9.99999974E-6 : f32
    %20 = vector.broadcast %cst_9 : f32 to vector<8x1xf32>
    %21 = arith.addf %17, %20 : vector<8x1xf32>
    %22 = math.rsqrt %21 : vector<8x1xf32>
    %23 = vector.broadcast %22 : vector<8x1xf32> to vector<8x64xf32>
    %24 = arith.mulf %19, %23 : vector<8x64xf32>
    %c0_10 = arith.constant 0 : index
    %c0_11 = arith.constant 0 : index
    %25 = vector.load %arg4[%c0_10, %c0_11] : memref<1x64xf32, #tpu.memory_space<vmem>>, vector<1x64xf32>
    %26 = vector.broadcast %25 : vector<1x64xf32> to vector<8x64xf32>
    %27 = arith.mulf %24, %26 : vector<8x64xf32>
    %c0_12 = arith.constant 0 : index
    %c0_13 = arith.constant 0 : index
    %28 = vector.load %arg5[%c0_12, %c0_13] : memref<1x64xf32, #tpu.memory_space<vmem>>, vector<1x64xf32>
    %29 = vector.broadcast %28 : vector<1x64xf32> to vector<8x64xf32>
    %30 = arith.addf %27, %29 : vector<8x64xf32>
    %31 = math.tanh %30 : vector<8x64xf32>
    %32 = arith.truncf %31 : vector<8x64xf32> to vector<8x64xbf16>
    %c0_14 = arith.constant 0 : index
    %c0_15 = arith.constant 0 : index
    %33 = vector.load %arg6[%c0_14, %c0_15] : memref<64x32xbf16, #tpu.memory_space<vmem>>, vector<64x32xbf16>
    %cst_16 = arith.constant dense<0.000000e+00> : vector<8x32xf32>
    %34 = tpu.matmul %32, %33, %cst_16 {dimension_numbers = #tpu.dot_dimension_numbers<[1], [0], [0], [1], [0, 0, 1, 1], [], []>} : vector<8x64xbf16>, vector<64x32xbf16>, vector<8x32xf32> -> vector<8x32xf32>
    %c0_17 = arith.constant 0 : index
    %c0_18 = arith.constant 0 : index
    %35 = vector.load %arg7[%c0_17, %c0_18] : memref<1x32xf32, #tpu.memory_space<vmem>>, vector<1x32xf32>
    %36 = vector.broadcast %35 : vector<1x32xf32> to vector<8x32xf32>
    %37 = arith.addf %34, %36 : vector<8x32xf32>
    %cst_19 = arith.constant 0.000000e+00 : f32
    %38 = vector.broadcast %cst_19 : f32 to vector<8x32xf32>
    %39 = arith.maximumf %37, %38 : vector<8x32xf32>
    %40 = arith.truncf %39 : vector<8x32xf32> to vector<8x32xbf16>
    %c0_20 = arith.constant 0 : index
    %c0_21 = arith.constant 0 : index
    %41 = vector.load %arg8[%c0_20, %c0_21] : memref<32x16xbf16, #tpu.memory_space<vmem>>, vector<32x16xbf16>
    %cst_22 = arith.constant dense<0.000000e+00> : vector<8x16xf32>
    %42 = tpu.matmul %40, %41, %cst_22 {dimension_numbers = #tpu.dot_dimension_numbers<[1], [0], [0], [1], [0, 0, 1, 1], [], []>} : vector<8x32xbf16>, vector<32x16xbf16>, vector<8x16xf32> -> vector<8x16xf32>
    %c0_23 = arith.constant 0 : index
    %c0_24 = arith.constant 0 : index
    %43 = vector.load %arg9[%c0_23, %c0_24] : memref<1x16xf32, #tpu.memory_space<vmem>>, vector<1x16xf32>
    %44 = vector.broadcast %43 : vector<1x16xf32> to vector<8x16xf32>
    %45 = arith.addf %42, %44 : vector<8x16xf32>
    %c0_25 = arith.constant 0 : index
    %c0_26 = arith.constant 0 : index
    %46 = vector.load %arg10[%c0_25, %c0_26] : memref<8x16xf32, #tpu.memory_space<vmem>>, vector<8x16xf32>
    tpu.vector_store %arg10[%c0_25, %c0_26], %45 {strides = array<i32>} : memref<8x16xf32, #tpu.memory_space<vmem>>, vector<8x16xf32>,
    return
  }
  func.func @transform_0(%arg0: i32) -> (i32, i32) {
    %c0_i32 = arith.constant 0 : i32
    %c0_i32_0 = arith.constant 0 : i32
    return %arg0, %c0_i32 : i32, i32
  }
  func.func @transform_1(%arg0: i32) -> (i32, i32) {
    %c0_i32 = arith.constant 0 : i32
    %c0_i32_0 = arith.constant 0 : i32
    %c0_i32_1 = arith.constant 0 : i32
    return %c0_i32, %c0_i32_0 : i32, i32
  }
  func.func @transform_2(%arg0: i32) -> (i32, i32) {
    %c0_i32 = arith.constant 0 : i32
    %c0_i32_0 = arith.constant 0 : i32
    %c0_i32_1 = arith.constant 0 : i32
    return %c0_i32, %c0_i32_0 : i32, i32
  }
  func.func @transform_3(%arg0: i32) -> (i32, i32) {
    %c0_i32 = arith.constant 0 : i32
    %c0_i32_0 = arith.constant 0 : i32
    %c0_i32_1 = arith.constant 0 : i32
    return %c0_i32, %c0_i32_0 : i32, i32
  }
  func.func @transform_4(%arg0: i32) -> (i32, i32) {
    %c0_i32 = arith.constant 0 : i32
    %c0_i32_0 = arith.constant 0 : i32
    %c0_i32_1 = arith.constant 0 : i32
    return %c0_i32, %c0_i32_0 : i32, i32
  }
  func.func @transform_5(%arg0: i32) -> (i32, i32) {
    %c0_i32 = arith.constant 0 : i32
    %c0_i32_0 = arith.constant 0 : i32
    %c0_i32_1 = arith.constant 0 : i32
    return %c0_i32, %c0_i32_0 : i32, i32
  }
  func.func @transform_6(%arg0: i32) -> (i32, i32) {
    %c0_i32 = arith.constant 0 : i32
    %c0_i32_0 = arith.constant 0 : i32
    %c0_i32_1 = arith.constant 0 : i32
    return %c0_i32, %c0_i32_0 : i32, i32
  }
  func.func @transform_7(%arg0: i32) -> (i32, i32) {
    %c0_i32 = arith.constant 0 : i32
    %c0_i32_0 = arith.constant 0 : i32
    %c0_i32_1 = arith.constant 0 : i32
    return %c0_i32, %c0_i32_0 : i32, i32
  }
  func.func @transform_8(%arg0: i32) -> (i32, i32) {
    %c0_i32 = arith.constant 0 : i32
    %c0_i32_0 = arith.constant 0 : i32
    %c0_i32_1 = arith.constant 0 : i32
    return %c0_i32, %c0_i32_0 : i32, i32
  }
  func.func @transform_9(%arg0: i32) -> (i32, i32) {
    %c0_i32 = arith.constant 0 : i32
    %c0_i32_0 = arith.constant 0 : i32
    return %arg0, %c0_i32 : i32, i32
  }
}

</mosaic_0001>

<bundles_post_ra>
// kernel: tpu_custom_call.1
= control target key start
LH: loop header
LB: loop body
LE: loop exit
PB: predicated region body
PF: predicated region fallthrough
CT: control target
= control target key end

     0   :  { %v397_v1 = vmov 0.0   ;;  %vm398_vm0 = vmmov 0   ;;  %vm59_vm1 = vcmask 261120   ;;  %s509_s0 = inlined_call_operand.vmem [shape: f32[8,32], index: 0, kind: input, shape index: {}]   ;;  %s510_s1 = inlined_call_operand.vmem [shape: bf16[32,64], index: 1, kind: input, shape index: {}]   ;;  %s511_s2 = inlined_call_operand.vmem [shape: f32[1,64], index: 2, kind: input, shape index: {}]   ;;  %s512_s3 = inlined_call_operand.vmem [shape: f32[1,64], index: 3, kind: input, shape index: {}]   ;;  %s513_s4 = inlined_call_operand.vmem [shape: f32[1,64], index: 4, kind: input, shape index: {}]   ;;  %s514_s5 = inlined_call_operand.vmem [shape: bf16[64,32], index: 5, kind: input, shape index: {}]   ;;  %s515_s6 = inlined_call_operand.vmem [shape: f32[1,32], index: 6, kind: input, shape index: {}]   ;;  %s516_s7 = inlined_call_operand.vmem [shape: bf16[32,16], index: 7, kind: input, shape index: {}]   ;;  %s517_s8 = inlined_call_operand.vmem [shape: f32[1,16], index: 8, kind: input, shape index: {}]   ;;  %s518_s9 = inlined_call_operand.hbm [shape: f32[8,16], index: 9, kind: output, shape index: {}]  }
   0x1   :  { %v361_v0 = vld [vmem:[%s510_s1] sm:$0xff]   ;;  %330 = vmatprep.subr.bf16.mxu0 %v397_v1  ;;  %338 = vmatprep.subr.bf16.mxu1 %v397_v1  ;;  %v362_v2 = vld [vmem:[%s510_s1 + $0x8] sm:$0xff]  }
   0x2   :  { %331 = vmatpush3.bf16.msra.mxu0 %v361_v0  ;;  %334 = vmatprep.mubr.msk.bf16.mxu0 %vm398_vm0, %v397_v1  ;;  %v34_v3 = vld [vmem:[%s509_s0] sm:$0xff] }
   0x3   :  { %332 = vmatprep.subr.bf16.mxu0 %v397_v1  ;;  %346 = vmatprep.mubr.msk.bf16.mxu1 %vm398_vm0, %v397_v1  ;;  %v35_v4 = vpack.c.bf16 %v34_v3, %v34_v3 }
   0x6   :  { %333 = vmatpush3.bf16.msra.mxu0 %v362_v2 }
   0x7   :  { %14 = vsyncpa [#allocation3], 0  ;;  %350 = vmatprep.subr.bf16.mxu0 %v397_v1  ;;  %v303_v5 = vld [vmem:[%s511_s2] ss:$0 sm:$0xff]  ;;  %vm103_vm2 = vcmask 523264   ;;  %v364_v15 = vld [vmem:[%s514_s5 + $0x8] sm:$0xff]  }
   0x8   :  { %v363_v14 = vld [vmem:[%s514_s5] sm:$0xff]   ;;  %v365_v16 = vld [vmem:[%s514_s5 + $0x10] sm:$0xff]   ;;  %v366_v17 = vld [vmem:[%s514_s5 + $0x18] sm:$0xff]   ;;  %s399_s10 = smov [#allocation2]   ;;  %vm287_vm3 = vcmask 130048  }
   0x9   :  { %335 = vmatmul.mubr.msk.bf16.vlgmr.msra.gmra.mrb[0].mxu0 %vm59_vm1, %v35_v4  ;;  %339 = vmatpush3.bf16.msra.mxu1 %v363_v14  ;;  %v367_v18 = vld [vmem:[%s516_s7] sm:$0xff]   ;;  %v368_v35 = vld [vmem:[%s516_s7 + $0x8] sm:$0xff]   ;;  %s295_s7 = sshll.u32 %s399_s10, 4  ;;  %s296_s7 = int_to_ptr.vmem [resolvable:$true] %s295_s7 }
   0xa   :  { %354 = vmatprep.mubr.msk.bf16.mxu0 %vm398_vm0, %v397_v1  ;;  %340 = vmatprep.subr.bf16.mxu1 %v397_v1  ;;  %v307_v28 = vld [vmem:[%s512_s3] ss:$0 sm:$0xff]  ;;  %p378_p1 = scmp.lt.s32.totalorder %s296_s7, %s296_s7 }
   0xb   :  { %351 = vmatpush3.bf16.msra.mxu0 %v367_v18  ;;  %v308_v30 = vld [vmem:[%s513_s4] ss:$0 sm:$0xff] }
   0xc   :  { %352 = vmatprep.subr.bf16.mxu0 %v397_v1  ;;  %v309_v36 = vld [vmem:[%s515_s6] ss:$0 sm:$0xff]  ;;  %s373_s6 = scalar_lea.vmem %s296_s7, 128 }
   0xd   :  { %341 = vmatpush3.bf16.msra.mxu1 %v364_v15  ;;  %v315_v44 = vld [vmem:[%s517_s8] ss:$0 sm:$0xff]  ;;  %p374_p0 = scmp.ne.s32.totalorder %s296_s7, %s373_s6  ;;  %p379_p2 = scmp.lt.s32.totalorder %s373_s6, %s373_s6 }
   0xe   :  { %342 = vmatprep.subr.bf16.mxu1 %v397_v1 }
   0xf   :  { %353 = vmatpush3.bf16.msra.mxu0 %v368_v35  ;;  %p380_p3 = por %p379_p2, %p378_p1 }
  0x11   :  { %343 = vmatpush3.bf16.msra.mxu1 %v365_v16  ;;  %p381_p4 = pnand %p380_p3, %p374_p0 }
  0x12   :  { %344 = vmatprep.subr.bf16.mxu1 %v397_v1 }
  0x15   :  { %345 = vmatpush3.bf16.msra.mxu1 %v366_v17 }
  0xdc   :  { %v97_v6 = vpop.f32.mrb[0].mxu0 }
  0xdd   :  { %v98_v7 = vadd.f32 %v303_v5, %v97_v6  ;;  %v336_v8 = vpop.f32.mrb[1].mxu0 }
  0xde   :  { %v100_v9 = vpop.f32.mrb[2].mxu0 }
  0xdf   :  { %v337_v10 = vpop.f32.mrb[3].mxu0  ;;  %v104_v11 = vsel %vm103_vm2, %v98_v7, 0.0  ;;  %v108_v12 = vmul.f32 %v98_v7, %v98_v7 }
  0xe0   :  { %105 = vadd.xlane.f32.xlu0 %v104_v11 }
  0xe1   :  { %v109_v13 = vsel %vm103_vm2, %v108_v12, 0.0 }
  0xe4   :  { %110 = vadd.xlane.f32.xlu0 %v109_v13 }
 0x16d   :  { %v106_v19 = vpop.xlane.xlu0 %105 }
 0x16e   :  { %v107_v20 = vmul.f32 0.015625, %v106_v19 }
 0x170   :  { %v113_v22 = vmul.f32 %v107_v20, %v107_v20  ;;  %v115_v26 = vsub.f32 %v98_v7, %v107_v20 }
 0x171   :  { %v111_v21 = vpop.xlane.xlu0 %110 }
 0x172   :  { %v112_v23 = vmul.f32 0.015625, %v111_v21 }
 0x174   :  { %v114_v24 = vsub.f32 %v112_v23, %v113_v22 }
 0x176   :  { %v116_v25 = vadd.f32 1e-05, %v114_v24 }
 0x178   :  { %369 = vrsqrt.f32 %v116_v25 }
 0x182   :  { %v370_v27 = vpop.eup %369 }
 0x183   :  { %v118_v29 = vmul.f32 %v370_v27, %v115_v26 }
 0x185   :  { %v126_v31 = vmul.f32 %v307_v28, %v118_v29 }
 0x187   :  { %v134_v32 = vadd.f32 %v308_v30, %v126_v31 }
 0x189   :  { %371 = vtanh.f32 %v134_v32 }
 0x193   :  { %v372_v33 = vpop.eup %371 }
 0x194   :  { %v136_v34 = vpack.c.bf16 %v372_v33, %v372_v33 }
 0x196   :  { %347 = vmatmul.mubr.msk.bf16.vlgmr.msra.gmra.mrb[0].mxu1 %vm103_vm2, %v136_v34 }
 0x269   :  { %v213_v37 = vpop.f32.mrb[0].mxu1 }
 0x26a   :  { %v214_v38 = vadd.f32 %v309_v36, %v213_v37  ;;  %v348_v39 = vpop.f32.mrb[1].mxu1 }
 0x26b   :  { %v216_v40 = vpop.f32.mrb[2].mxu1 }
 0x26c   :  { %v219_v41 = vmax.f32 %v214_v38, 0.0  ;;  %v349_v42 = vpop.f32.mrb[3].mxu1 }
 0x26e   :  { %v220_v43 = vpack.c.bf16 %v219_v41, %v219_v41 }
 0x270   :  { %355 = vmatmul.mubr.msk.bf16.vlgmr.msra.gmra.mrb[4].mxu0 %vm59_vm1, %v220_v43 }
 0x343   :  { %v281_v45 = vpop.f32.mrb[4].mxu0 }
 0x344   :  { %v282_v46 = vadd.f32 %v315_v44, %v281_v45  ;;  %v356_v47 = vpop.f32.mrb[5].mxu0 }
 0x345   :  { %v284_v48 = vpop.f32.mrb[6].mxu0 }
 0x346   :  { %v357_v49 = vpop.f32.mrb[7].mxu0  ;;  %288 = vst.msk [vmem:[#allocation2] sm:$0xff] %vm287_vm3, %v282_v46 }
 0x347   :  { %384 = shalt.err (!%p381_p4)
}
 0x348   :  { %s385_s8 = scalar_lea.hbm %s518_s9, 128 }
 0x349   :  { %p386_p5 = scmp.ne.s32.totalorder %s518_s9, %s385_s8  ;;  %p389_p6 = scmp.lt.u32.totalorder %s385_s8, %s518_s9 }
 0x34b   :  { %p391_p7 = pnand %p389_p6, %p386_p5 }
 0x34d   :  { %394 = shalt.err (!%p391_p7)
}
 0x34e   :  { %298 = dma.vmem_to_hbm [thread:$0]  %s296_s7, 128, %s518_s9, [#allocation3]  }
 0x34f   :  { %395 = dma.done.wait [#allocation3], 128  }
 0x350   :  { %396 = vsyncadd [#allocation3], 4294967168 }
 0x351   :  { %302 = vsyncpa [#allocation3], 1 }

</bundles_post_ra>
